<compile_context>
chip_gen: v5e
topology: v5e:2x2
jax: 0.10.0
libtpu: 0.0.40
codegen_flags: <defaults>
</compile_context>

<pallas_src>
import functools
import math

import jax
import jax.numpy as jnp
from jax.experimental import pallas as pl
from jax.experimental.pallas import tpu as pltpu

_LANES = 128
_NEG2_LOG_1E4 = -2.0 * math.log(10000.0)
_HALF_PI = math.pi / 2.0
_SMALL_INPUT_BYTES = 1 << 20   # below this a single block beats any grid overhead
_MIN_GRID_STEPS = 4            # pipelining + megacore / 2nd-TC occupancy


def make_position_encoding(d_model: int, max_len: int) -> jnp.ndarray:
    """Replicates PositionEncoding.__init__ buffer `pe` (float32). Reference only."""
    position = jnp.arange(0, max_len, dtype=jnp.float32)[:, None]
    embedding_index = jnp.arange(0, d_model, 2, dtype=jnp.float32)
    div_term = 1.0 / (jnp.float32(10000.0) ** (embedding_index / d_model))
    angles = position * div_term
    pe = jnp.zeros((max_len, d_model), dtype=jnp.float32)
    pe = pe.at[:, 0::2].set(jnp.sin(angles))
    pe = pe.at[:, 1::2].set(jnp.cos(angles))
    return pe


# ----------------------------------------------------------------------------
# Hardware-aware tiling helpers
# ----------------------------------------------------------------------------

def _vmem_budget():
    """(per-buffer tile-byte target, vmem_limit_bytes) sized per TPU generation."""
    try:
        cap = int(getattr(pltpu.get_tpu_info(), "vmem_capacity_bytes", 0)) or (64 << 20)
    except Exception:
        cap = 64 << 20
    if cap >= (96 << 20):            # v5e / v6e: 128 MiB physical VMEM
        return 8 << 20, 48 << 20
    return 4 << 20, 32 << 20         # v7x: 64 MiB physical VMEM


def _sublane_multiple(dtype) -> int:
    # f32 -> 8, bf16/f16 -> 16, int8/fp8 -> 32 (dtype-packed sublane tiles)
    return max(8, 32 // jnp.dtype(dtype).itemsize)


def _choose_tile(n_major: int, bytes_per_major: int, sub: int,
                 tile_bytes_target: int, cap) -> int:
    """Block size along the sublane-tiled (major) axis."""
    total_bytes = n_major * bytes_per_major
    if n_major <= sub or total_bytes <= _SMALL_INPUT_BYTES:
        tile = n_major                                   # full dim -> always legal
    else:
        by_vmem = (tile_bytes_target // bytes_per_major) // sub * sub
        by_grid = (pl.cdiv(n_major, _MIN_GRID_STEPS) // sub) * sub
        tile = max(sub, min(by_vmem, by_grid))
    if cap is not None and cap < tile:
        tile = max(sub, (cap // sub) * sub)
    return min(tile, n_major)


# ----------------------------------------------------------------------------
# Kernels: pe generated in-register; only x streams through HBM.
# ----------------------------------------------------------------------------

def _pe_add_flat_kernel(x_ref, o_ref, *, d_model: int, tile_rows: int):
    """Lane-dense path: x viewed as (n_rows, 128) row-major flatten of (seq, d_model).

    Requires d_model to divide 128 (power of two), so the feature index depends
    only on the lane and all column math hoists to (1, 128) vectors.
    """
    shift = d_model.bit_length() - 1          # log2(d_model)
    rows_per_vrow = _LANES // d_model         # positions packed per 128-lane row

    # Per-lane constants (computed once per grid step on a (1, 128) vector).
    lane = jax.lax.broadcasted_iota(jnp.int32, (1, _LANES), 1)
    col = lane & (d_model - 1)                              # feature index j
    lane_pos = (lane >> shift).astype(jnp.float32)          # position offset in a row
    pair = (col >> 1).astype(jnp.float32)                   # k = j // 2
    inv_freq = jnp.exp(pair * jnp.float32(_NEG2_LOG_1E4 / d_model))
    phase = (col & 1).astype(jnp.float32) * jnp.float32(_HALF_PI)   # cos = sin(x+pi/2)
    a_lane = inv_freq * jnp.float32(rows_per_vrow)                  # row coefficient
    b_lane = lane_pos * inv_freq + phase                            # lane offset term

    # Per-row term: global 128-lane-row index as float (tile_rows, 1).
    row = (jax.lax.broadcasted_iota(jnp.int32, (tile_rows, 1), 0)
           + pl.program_id(0) * tile_rows).astype(jnp.float32)

    pe = jnp.sin(row * a_lane + b_lane)                     # (tile_rows, 128)
    o_ref[...] = (x_ref[...].astype(jnp.float32) + pe).astype(o_ref.dtype)


def _pe_add_2d_kernel(x_ref, o_ref, *, d_model: int, tile_s: int):
    """General 2D path: block = (tile_s, d_model). Lane-dense when d_model % 128 == 0."""
    # Per-column constants, hoisted to a (1, d_model) vector.
    col = jax.lax.broadcasted_iota(jnp.int32, (1, d_model), 1)
    pair = (col >> 1).astype(jnp.float32)
    inv_freq = jnp.exp(pair * jnp.float32(_NEG2_LOG_1E4 / d_model))
    phase = (col & 1).astype(jnp.float32) * jnp.float32(_HALF_PI)

    pos = (jax.lax.broadcasted_iota(jnp.int32, (tile_s, 1), 0)
           + pl.program_id(0) * tile_s).astype(jnp.float32)

    pe = jnp.sin(pos * inv_freq + phase)                    # (tile_s, d_model)
    o_ref[...] = (x_ref[...].astype(jnp.float32) + pe).astype(o_ref.dtype)


# ----------------------------------------------------------------------------
# Wrappers
# ----------------------------------------------------------------------------

def _forward_flat(x, *, max_tile_rows=None, donate_input=False):
    seq_len, d_model = x.shape
    n_rows = (seq_len * d_model) // _LANES
    sub = _sublane_multiple(x.dtype)
    bytes_per_row = _LANES * jnp.dtype(x.dtype).itemsize
    tile_target, vmem_limit = _vmem_budget()
    tile_rows = _choose_tile(n_rows, bytes_per_row, sub, tile_target, max_tile_rows)
    grid = (pl.cdiv(n_rows, tile_rows),)

    x_flat = x.reshape(n_rows, _LANES)      # contiguous row-major reshape: zero-copy
    kernel = functools.partial(_pe_add_flat_kernel, d_model=d_model, tile_rows=tile_rows)
    out_flat = pl.pallas_call(
        kernel,
        out_shape=jax.ShapeDtypeStruct((n_rows, _LANES), x.dtype),
        grid_spec=pltpu.PrefetchScalarGridSpec(
            num_scalar_prefetch=0,
            grid=grid,
            in_specs=[pl.BlockSpec((tile_rows, _LANES), lambda i: (i, 0))],
            out_specs=pl.BlockSpec((tile_rows, _LANES), lambda i: (i, 0)),
        ),
        compiler_params=pltpu.CompilerParams(
            dimension_semantics=("parallel",),
            vmem_limit_bytes=vmem_limit,
        ),
        input_output_aliases=({0: 0} if donate_input else {}),
    )(x_flat)
    return out_flat.reshape(seq_len, d_model)


def _forward_2d(x, *, max_tile_seq=None, donate_input=False):
    seq_len, d_model = x.shape
    sub = _sublane_multiple(x.dtype)
    bytes_per_row = d_model * jnp.dtype(x.dtype).itemsize
    tile_target, vmem_limit = _vmem_budget()
    tile_s = _choose_tile(seq_len, bytes_per_row, sub, tile_target, max_tile_seq)
    grid = (pl.cdiv(seq_len, tile_s),)

    kernel = functools.partial(_pe_add_2d_kernel, d_model=d_model, tile_s=tile_s)
    return pl.pallas_call(
        kernel,
        out_shape=jax.ShapeDtypeStruct((seq_len, d_model), x.dtype),
        grid_spec=pltpu.PrefetchScalarGridSpec(
            num_scalar_prefetch=0,
            grid=grid,
            in_specs=[pl.BlockSpec((tile_s, d_model), lambda i: (i, 0))],
            out_specs=pl.BlockSpec((tile_s, d_model), lambda i: (i, 0)),
        ),
        compiler_params=pltpu.CompilerParams(
            dimension_semantics=("parallel",),
            vmem_limit_bytes=vmem_limit,
        ),
        input_output_aliases=({0: 0} if donate_input else {}),
    )(x)


def position_encoding_forward(word_embeddings,
                              *,
                              max_tile_rows=None,
                              max_tile_seq=None,
                              donate_input: bool = False):
    """out = word_embeddings + pe[:seq_len, :], pe computed in-kernel."""
    seq_len, d_model = word_embeddings.shape
    # Lane-dense flatten when d_model divides 128 and the flatten packs exactly
    # into 128-wide rows.
    if (d_model <= _LANES and _LANES % d_model == 0
            and (seq_len * d_model) % _LANES == 0):
        return _forward_flat(word_embeddings, max_tile_rows=max_tile_rows,
                             donate_input=donate_input)
    # TODO(synk): d_model that is neither a divisor nor a multiple of 128 still
    # takes masked partial stores here; a padded lane-dense slab path could
    # recover full-width vst for those shapes.
    return _forward_2d(word_embeddings, max_tile_seq=max_tile_seq,
                       donate_input=donate_input)


if __name__ == "__main__":
    key = jax.random.PRNGKey(0)
    ks = jax.random.split(key, 6)

    def _check(seq_len, d_model, k, dtype=jnp.float32, atol=1e-4, rtol=1e-4, **kw):
        x = jax.random.normal(k, (seq_len, d_model), dtype=jnp.float32).astype(dtype)
        pe = make_position_encoding(d_model=d_model, max_len=seq_len)
        ref = (x.astype(jnp.float32) + pe).astype(dtype)
        out = jax.block_until_ready(position_encoding_forward(x, **kw))
        assert out.shape == x.shape and out.dtype == x.dtype
        assert jnp.allclose(out.astype(jnp.float32), ref.astype(jnp.float32),
                            atol=atol, rtol=rtol), (seq_len, d_model, str(dtype))

    # Toy size consistent with the StatQuest module usage: seq=8 tokens, d_model=32
    # (lane-dense flat path, single block).
    _check(8, 32, ks[0])
    # d_model=128: flat path, multi-block grid forced via the tile cap (grid=2).
    _check(16, 128, ks[1], max_tile_rows=8)
    # d_model=256 (multiple of 128): 2D lane-dense path, tiled seq axis (grid=2).
    _check(16, 256, ks[2], max_tile_seq=8)
    # Larger input (> 1 MiB): auto-tiled grid with >= 4 steps. Looser tolerance
    # because sin/cos range reduction at position ~1e3 differs at the 1e-4 level
    # between the in-kernel and XLA reference paths.
    _check(1024, 512, ks[3], atol=5e-3, rtol=1e-3)
    # bf16 input: 16-row packed sublane tiles, bf16-safe store.
    _check(128, 64, ks[4], dtype=jnp.bfloat16, atol=3e-2, rtol=3e-2)

    # In-place variant: input_output_aliases={0: 0} with a donated jit argument.
    x = jax.random.normal(ks[5], (64, 128), dtype=jnp.float32)
    ref = x + make_position_encoding(d_model=128, max_len=64)
    fwd = jax.jit(functools.partial(position_encoding_forward, donate_input=True),
                  donate_argnums=0)
    out = jax.block_until_ready(fwd(x))
    assert jnp.allclose(out, ref, atol=1e-4, rtol=1e-4)

    print("KERNEL_OK")
</pallas_src>

<mosaic_0001>
module attributes {stable_mosaic.version = 11 : i64} {
  func.func @_pe_add_flat_kernel(%arg0: i32, %arg1: memref<2x128xf32, #tpu.memory_space<vmem>>, %arg2: memref<2x128xf32, #tpu.memory_space<vmem>>) attributes {dimension_semantics = [#tpu.dimension_semantics<parallel>], iteration_bounds = array<i64: 1>, scalar_prefetch = 0 : i64, scratch_operands = 0 : i64, tpu.core_type = #tpu.core_type<tc>, window_params = [{transform_indices = @transform_0, window_bounds = array<i64: 2, 128>}, {transform_indices = @transform_1, window_bounds = array<i64: 2, 128>}]} {
    %0 = tpu.iota {dimensions = array<i32: 1>} : vector<1x128xi32>
    %c31_i32 = arith.constant 31 : i32
    %1 = vector.broadcast %c31_i32 : i32 to vector<1x128xi32>
    %2 = arith.andi %0, %1 : vector<1x128xi32>
    %c5_i32 = arith.constant 5 : i32
    %3 = vector.broadcast %c5_i32 : i32 to vector<1x128xi32>
    %4 = arith.shrsi %0, %3 : vector<1x128xi32>
    %5 = arith.sitofp %4 : vector<1x128xi32> to vector<1x128xf32>
    %c1_i32 = arith.constant 1 : i32
    %6 = vector.broadcast %c1_i32 : i32 to vector<1x128xi32>
    %7 = arith.shrsi %2, %6 : vector<1x128xi32>
    %8 = arith.sitofp %7 : vector<1x128xi32> to vector<1x128xf32>
    %cst = arith.constant -0.575646281 : f32
    %9 = vector.broadcast %cst : f32 to vector<1x128xf32>
    %10 = arith.mulf %8, %9 : vector<1x128xf32>
    %11 = math.exp %10 : vector<1x128xf32>
    %c1_i32_0 = arith.constant 1 : i32
    %12 = vector.broadcast %c1_i32_0 : i32 to vector<1x128xi32>
    %13 = arith.andi %2, %12 : vector<1x128xi32>
    %14 = arith.sitofp %13 : vector<1x128xi32> to vector<1x128xf32>
    %cst_1 = arith.constant 1.57079637 : f32
    %15 = vector.broadcast %cst_1 : f32 to vector<1x128xf32>
    %16 = arith.mulf %14, %15 : vector<1x128xf32>
    %cst_2 = arith.constant 4.000000e+00 : f32
    %17 = vector.broadcast %cst_2 : f32 to vector<1x128xf32>
    %18 = arith.mulf %11, %17 : vector<1x128xf32>
    %19 = arith.mulf %5, %11 : vector<1x128xf32>
    %20 = arith.addf %19, %16 : vector<1x128xf32>
    %21 = tpu.iota {dimensions = array<i32: 0>} : vector<2x1xi32>
    %c2_i32 = arith.constant 2 : i32
    %22 = arith.muli %arg0, %c2_i32 : i32
    %23 = vector.broadcast %22 : i32 to vector<2x1xi32>
    %24 = arith.addi %21, %23 : vector<2x1xi32>
    %25 = arith.sitofp %24 : vector<2x1xi32> to vector<2x1xf32>
    %26 = vector.broadcast %25 : vector<2x1xf32> to vector<2x128xf32>
    %27 = vector.broadcast %18 : vector<1x128xf32> to vector<2x128xf32>
    %28 = arith.mulf %26, %27 : vector<2x128xf32>
    %29 = vector.broadcast %20 : vector<1x128xf32> to vector<2x128xf32>
    %30 = arith.addf %28, %29 : vector<2x128xf32>
    %31 = math.sin %30 : vector<2x128xf32>
    %c0 = arith.constant 0 : index
    %c0_3 = arith.constant 0 : index
    %32 = vector.load %arg1[%c0, %c0_3] : memref<2x128xf32, #tpu.memory_space<vmem>>, vector<2x128xf32>
    %33 = arith.addf %32, %31 : vector<2x128xf32>
    %c0_4 = arith.constant 0 : index
    %c0_5 = arith.constant 0 : index
    %34 = vector.load %arg2[%c0_4, %c0_5] : memref<2x128xf32, #tpu.memory_space<vmem>>, vector<2x128xf32>
    tpu.vector_store %arg2[%c0_4, %c0_5], %33 {strides = array<i32>} : memref<2x128xf32, #tpu.memory_space<vmem>>, vector<2x128xf32>,
    return
  }
  func.func @transform_0(%arg0: i32) -> (i32, i32) {
    %c0_i32 = arith.constant 0 : i32
    %c0_i32_0 = arith.constant 0 : i32
    return %arg0, %c0_i32 : i32, i32
  }
  func.func @transform_1(%arg0: i32) -> (i32, i32) {
    %c0_i32 = arith.constant 0 : i32
    %c0_i32_0 = arith.constant 0 : i32
    return %arg0, %c0_i32 : i32, i32
  }
}

</mosaic_0001>

<bundles_post_ra>
// kernel: tpu_custom_call.1
= control target key start
LH: loop header
LB: loop body
LE: loop exit
PB: predicated region body
PF: predicated region fallthrough
CT: control target
= control target key end

     0   :  { %6 = vsyncpa [#allocation3], 0  ;;  %s359_s0 = inlined_call_operand.hbm [shape: f32[2,128], index: 0, kind: input, shape index: {}]   ;;  %s360_s1 = inlined_call_operand.hbm [shape: f32[2,128], index: 1, kind: output, shape index: {}]  }
   0x1   :  { %7 = vsyncpa [#allocation4], 0  ;;  %s13_s8 = sshll.u32 %s359_s0, 4  ;;  %s288_s9 = smov [#allocation2]   ;;  %s14_s8 = int_to_ptr.hbm [resolvable:$true] %s13_s8 }
   0x2   :  { %s15_s10 = sshll.u32 %s288_s9, 4  ;;  %s16_s10 = int_to_ptr.vmem [resolvable:$true] %s15_s10 }
   0x3   :  { %18 = dma.hbm_to_vmem [thread:$0]  %s14_s8, 32, %s16_s10, [#allocation3]  }
   0x4   :  { %284 = dma.done.wait [#allocation3], 32  }
   0x5   :  { %285 = vsyncadd [#allocation3], 4294967264  ;;  %v23_v0 = vlaneseq  ;;  %v289_v31 = vmov 683565275   ;;  %v290_v33 = vmov 2475754826  }
   0x6   :  { %v291_v35 = vmov 2131351028   ;;  %v292_v37 = vmov 2102212464   ;;  %v293_v39 = vmov 920167782  }
   0x7   :  { %v24_v1 = vand.u32 127, %v23_v0  ;;  %v40_v10 = vshrl.u32 %v23_v0, 7  ;;  %v294_v45 = vmov 1326507024   ;;  %s296_s0 = smov [#allocation5]   ;;  %s212_s14 = sshll.u32 %s360_s1, 4  ;;  %s213_s14 = int_to_ptr.hbm [resolvable:$true] %s212_s14 }
   0x8   :  { %s210_s11 = sshll.u32 %s296_s0, 4  ;;  %s211_s11 = int_to_ptr.vmem [resolvable:$true] %s210_s11 }
   0x9   :  { %v25_v2 = vand.u32 31, %v24_v1  ;;  %v26_v8 = vshra.s32 %v24_v1, 5  ;;  %v44_v13 = vcvt.s32.f32 %v40_v10 }
   0xb   :  { %v28_v3 = vshra.s32 %v25_v2, 1  ;;  %v33_v6 = vand.u32 1, %v25_v2  ;;  %v27_v11 = vcvt.s32.f32 %v26_v8 }
   0xd   :  { %v29_v4 = vcvt.s32.f32 %v28_v3  ;;  %v34_v9 = vcvt.s32.f32 %v33_v6 }
   0xf   :  { %v30_v5 = vmul.f32 -0.5756463, %v29_v4  ;;  %v35_v12 = vmul.f32 1.5707964, %v34_v9 }
  0x11   :  { %v31_v7 = vmul.f32 1.442695, %v30_v5 }
  0x13   :  { %234 = vpow2.f32 %v31_v7 }
  0x19   :  { %v235_v14 = vpop.eup %234 }
  0x1a   :  { %v36_v15 = vmul.f32 4.0, %v235_v14  ;;  %v37_v16 = vmul.f32 %v235_v14, %v27_v11 }
  0x1c   :  { %v38_v17 = vadd.f32 %v37_v16, %v35_v12  ;;  %v45_v18 = vmul.f32 %v44_v13, %v36_v15 }
  0x1e   :  { %v310_v19 = vadd.f32 %v45_v18, %v38_v17 }
  0x20   :  { %v50_v20 = vand.u32 2139095040, %v310_v19  ;;  %v47_v22 = vand.u32 2147483647, %v310_v19  ;;  %vm49_vm12 = vcmp.lt.s32.totalorder %v310_v19, 0 }
  0x22   :  { %v51_v21 = vshrl.u32 %v50_v20, 23  ;;  %v54_v25 = vand.u32 8388607, %v47_v22  ;;  %v295_v20 = vmov 0   ;;  %vm48_vm13 = vcmp.le.f32.partialorder %v47_v22, 0.7853982 }
  0x24   :  { %v222_v23 = vadd.s32 4294967169, %v51_v21  ;;  %v55_v28 = vor.u32 8388608, %v54_v25 }
  0x26   :  { %v57_v24 = vadd.s32 1, %v222_v23  ;;  %v319_v47 = vshll.u32 %v55_v28, 8 }
  0x28   :  { %vm58_vm0 = vcmp.gt.s32.totalorder %v57_v24, 0  ;;  %v96_v59 = vand.u32 65535, %v319_v47  ;;  %v97_v60 = vshrl.u32 %v319_v47, 16 }
  0x29   :  { %v59_v26 = vsel %vm58_vm0, %v57_v24, 0 }
  0x2a   :  { %v61_v27 = vand.u32 31, %v59_v26  ;;  %v316_v29 = vshrl.u32 %v59_v26, 5 }
  0x2c   :  { %v62_v30 = vsub.s32 32, %v61_v27  ;;  %v64_v32 = vshll.u32 %v289_v31, %v61_v27  ;;  %v67_v34 = vshll.u32 %v290_v33, %v61_v27  ;;  %v70_v36 = vshll.u32 %v291_v35, %v61_v27 }
  0x2d   :  { %v73_v38 = vshll.u32 %v292_v37, %v61_v27  ;;  %v76_v40 = vshll.u32 %v293_v39, %v61_v27  ;;  %vm79_vm1 = vcmp.lt.s32.totalorder %v316_v29, 1  ;;  %vm82_vm2 = vcmp.lt.s32.totalorder %v316_v29, 4 }
  0x2e   :  { %v65_v41 = vshrl.u32 %v290_v33, %v62_v30  ;;  %v68_v42 = vshrl.u32 %v291_v35, %v62_v30  ;;  %v71_v43 = vshrl.u32 %v292_v37, %v62_v30  ;;  %v74_v44 = vshrl.u32 %v293_v39, %v62_v30 }
  0x2f   :  { %v77_v46 = vshrl.u32 %v294_v45, %v62_v30  ;;  %vm81_vm3 = vcmp.lt.s32.totalorder %v316_v29, 3  ;;  %vm80_vm4 = vcmp.lt.s32.totalorder %v316_v29, 2  ;;  %v63_v3 = vshrl.u32 %v289_v31, %v62_v30 }
  0x30   :  { %v66_v48 = vor.u32 %v65_v41, %v64_v32  ;;  %v69_v49 = vor.u32 %v68_v42, %v67_v34  ;;  %v72_v50 = vor.u32 %v71_v43, %v70_v36  ;;  %v75_v51 = vor.u32 %v74_v44, %v73_v38 }
  0x31   :  { %v78_v52 = vor.u32 %v77_v46, %v76_v40 }
  0x32   :  { %v87_v53 = vsel %vm79_vm1, %v66_v48, %v69_v49  ;;  %v91_v54 = vsel %vm79_vm1, %v69_v49, %v72_v50  ;;  %v88_v55 = vsel %vm82_vm2, %v75_v51, 920167782  ;;  %v83_v16 = vsel %vm79_vm1, %v63_v3, %v66_v48 }
  0x33   :  { %v92_v56 = vsel %vm82_vm2, %v78_v52, 1326507024  ;;  %v89_v57 = vsel %vm81_vm3, %v72_v50, %v88_v55  ;;  %v84_v18 = vsel %vm82_vm2, %v72_v50, 2102212464  ;;  %vm190_vm1 = vweird.f32 %v310_v19 }
  0x34   :  { %v93_v58 = vsel %vm81_vm3, %v75_v51, %v92_v56  ;;  %v90_v61 = vsel %vm80_vm4, %v87_v53, %v89_v57  ;;  %v85_v31 = vsel %vm81_vm3, %v69_v49, %v84_v18 }
  0x35   :  { %v94_v62 = vsel %vm80_vm4, %v91_v54, %v93_v58  ;;  %v120_v1 = vand.u32 65535, %v90_v61  ;;  %v121_v2 = vshrl.u32 %v90_v61, 16  ;;  %v86_v39 = vsel %vm80_vm4, %v83_v16, %v85_v31  ;;  %v202_v31 = vld [vmem:[#allocation2] sm:$0x3] }
  0x36   :  { %v98_v63 = vand.u32 65535, %v94_v62  ;;  %v99_v0 = vshrl.u32 %v94_v62, 16  ;;  %v140_v43 = vmul.u32 %v319_v47, %v86_v39 }
  0x37   :  { %v122_v7 = vmul.u32 %v120_v1, %v96_v59  ;;  %v123_v8 = vmul.u32 %v121_v2, %v96_v59  ;;  %v124_v9 = vmul.u32 %v120_v1, %v97_v60  ;;  %v125_v13 = vmul.u32 %v121_v2, %v97_v60 }
  0x38   :  { %v100_v4 = vmul.u32 %v98_v63, %v96_v59  ;;  %v101_v5 = vmul.u32 %v99_v0, %v96_v59  ;;  %v102_v6 = vmul.u32 %v98_v63, %v97_v60  ;;  %v103_v10 = vmul.u32 %v99_v0, %v97_v60 }
  0x39   :  { %v126_v14 = vshll.u32 %v123_v8, 16  ;;  %v128_v15 = vshll.u32 %v124_v9, 16  ;;  %v127_v28 = vshrl.u32 %v123_v8, 16  ;;  %v129_v35 = vshrl.u32 %v124_v9, 16 }
  0x3a   :  { %v104_v11 = vshll.u32 %v101_v5, 16  ;;  %v106_v12 = vshll.u32 %v102_v6, 16  ;;  %v105_v24 = vshrl.u32 %v101_v5, 16  ;;  %v107_v32 = vshrl.u32 %v102_v6, 16 }
  0x3b   :  { %vm130_vm6 = vc.u32 %v122_v7, %v126_v14  ;;  %v132_v23 = vadd.s32 %v126_v14, %v122_v7 }
  0x3c   :  { %vm108_vm5 = vc.u32 %v100_v4, %v104_v11  ;;  %v110_v17 = vadd.s32 %v104_v11, %v100_v4  ;;  %v131_v26 = vsel %vm130_vm6, 1, %v295_v20 }
  0x3d   :  { %v109_v21 = vsel %vm108_vm5, 1, %v295_v20  ;;  %v133_v30 = vadd.s32 %v131_v26, %v125_v13  ;;  %vm134_vm8 = vc.u32 %v132_v23, %v128_v15  ;;  %v136_v38 = vadd.s32 %v132_v23, %v128_v15 }
  0x3e   :  { %v111_v25 = vadd.s32 %v109_v21, %v103_v10  ;;  %vm112_vm7 = vc.u32 %v110_v17, %v106_v12  ;;  %v135_v34 = vsel %vm134_vm8, 1, %v295_v20 }
  0x3f   :  { %v113_v27 = vsel %vm112_vm7, 1, %v295_v20  ;;  %v137_v36 = vadd.s32 %v135_v34, %v133_v30 }
  0x40   :  { %v115_v33 = vadd.s32 %v113_v27, %v111_v25 }
  0x41   :  { %v138_v40 = vadd.s32 %v137_v36, %v127_v28 }
  0x42   :  { %v116_v37 = vadd.s32 %v115_v33, %v105_v24 }
  0x43   :  { %v139_v42 = vadd.s32 %v138_v40, %v129_v35 }
  0x44   :  { %v117_v41 = vadd.s32 %v116_v37, %v107_v32 }
  0x45   :  { %v143_v44 = vadd.s32 1, %v139_v42 }
  0x46   :  { %vm142_vm9 = vc.u32 %v117_v41, %v136_v38  ;;  %v141_v29 = vadd.s32 %v136_v38, %v117_v41 }
  0x47   :  { %v144_v45 = vsel %vm142_vm9, %v143_v44, %v139_v42 }
  0x48   :  { %v145_v46 = vadd.s32 %v144_v45, %v140_v43 }
  0x4a   :  { %v146_v48 = vadd.s32 536870912, %v145_v46 }
  0x4c   :  { %v147_v49 = vshrl.u32 %v146_v48, 30 }
  0x4e   :  { %v148_v50 = vshll.u32 %v147_v49, 30  ;;  %v171_v3 = vsub.s32 4, %v147_v49 }
  0x50   :  { %v149_v51 = vsub.s32 %v145_v46, %v148_v50  ;;  %v172_v6 = vsel %vm49_vm12, %v171_v3, %v147_v49 }
  0x51   :  { %v174_v9 = vsel %vm48_vm13, 0, %v172_v6 }
  0x52   :  { %vm150_vm10 = vcmp.lt.s32.totalorder %v149_v51, 0  ;;  %v151_v52 = vsub.s32 0, %v149_v51  ;;  %v191_v14 = vadd.s32 3, %v174_v9 }
  0x54   :  { %v152_v53 = vsel %vm150_vm10, %v151_v52, %v149_v51  ;;  %v192_v20 = vand.u32 3, %v191_v14 }
  0x55   :  { %v153_v54 = vclz %v152_v53 }
  0x56   :  { %vm197_vm14 = vcmp.eq.s32.totalorder %v192_v20, 2  ;;  %vm194_vm15 = vcmp.eq.s32.totalorder %v192_v20, 0  ;;  %vm193_vm0 = vcmp.lt.s32.totalorder %v192_v20, 2 }
  0x57   :  { %v223_v55 = vadd.s32 4294967294, %v153_v54 }
  0x59   :  { %vm224_vm11 = vcmp.lt.s32.totalorder %v223_v55, 0 }
  0x5a   :  { %v156_v56 = vsel %vm224_vm11, 0, %v223_v55 }
  0x5b   :  { %v157_v57 = vsub.s32 32, %v156_v56  ;;  %v158_v58 = vshll.u32 %v149_v51, %v156_v56  ;;  %v161_v59 = vsub.s32 4294967266, %v156_v56 }
  0x5d   :  { %v159_v47 = vshrl.u32 %v141_v29, %v157_v57  ;;  %v162_v60 = vadd.s32 127, %v161_v59 }
  0x5f   :  { %v160_v61 = vor.u32 %v159_v47, %v158_v58  ;;  %v163_v62 = vshll.u32 %v162_v60, 23 }
  0x61   :  { %v164_v63 = vor.u32 4788187, %v163_v62  ;;  %v167_v0 = vcvt.s32.f32 %v160_v61 }
  0x63   :  { %v165_v1 = vand.u32 2147483647, %v164_v63 }
  0x65   :  { %v168_v2 = vmul.f32 %v167_v0, %v165_v1 }
  0x67   :  { %v169_v4 = vxor.u32 2147483648, %v168_v2 }
  0x69   :  { %v170_v5 = vsel %vm49_vm12, %v169_v4, %v168_v2 }
  0x6a   :  { %v173_v7 = vsel %vm48_vm13, %v310_v19, %v170_v5 }
  0x6b   :  { %v175_v8 = vmul.f32 %v173_v7, %v173_v7 }
  0x6d   :  { %v176_v10 = vmul.f32 -0.001358992, %v175_v8  ;;  %v183_v11 = vmul.f32 -0.00019511016, %v175_v8 }
  0x6f   :  { %v177_v12 = vadd.f32 0.041655596, %v176_v10  ;;  %v184_v13 = vadd.f32 0.008332121, %v183_v11 }
  0x71   :  { %v178_v15 = vmul.f32 %v177_v12, %v175_v8  ;;  %v185_v16 = vmul.f32 %v184_v13, %v175_v8 }
  0x73   :  { %v179_v17 = vadd.f32 -0.4999988, %v178_v15  ;;  %v186_v18 = vadd.f32 -0.16666654, %v185_v16 }
  0x75   :  { %v180_v21 = vmul.f32 %v179_v17, %v175_v8  ;;  %v187_v23 = vmul.f32 %v186_v18, %v175_v8 }
  0x77   :  { %v181_v22 = vadd.f32 1.0, %v180_v21  ;;  %v188_v24 = vadd.f32 1.0, %v187_v23 }
  0x79   :  { %v189_v25 = vmul.f32 %v188_v24, %v173_v7  ;;  %v198_v26 = vxor.u32 2147483648, %v181_v22 }
  0x7b   :  { %v195_v27 = vxor.u32 2147483648, %v189_v25  ;;  %v199_v28 = vsel %vm197_vm14, %v198_v26, %v189_v25 }
  0x7d   :  { %v196_v30 = vsel %vm194_vm15, %v181_v22, %v195_v27 }
  0x7e   :  { %v200_v32 = vsel %vm193_vm0, %v196_v30, %v199_v28 }
  0x7f   :  { %v201_v33 = vsel %vm190_vm1, nan, %v200_v32 }
  0x80   :  { %v203_v34 = vadd.f32 %v202_v31, %v201_v33 }
  0x82   :  { %204 = vst [vmem:[#allocation5] sm:$0x3] %v203_v34 }
  0x83   :  { %215 = dma.vmem_to_hbm [thread:$0]  %s211_s11, 32, %s213_s14, [#allocation4]  }
  0x84   :  { %286 = dma.done.wait [#allocation4], 32  }
  0x85   :  { %287 = vsyncadd [#allocation4], 4294967264 }
  0x86   :  { %220 = vsyncpa [#allocation3], 1 }
  0x87   :  { %221 = vsyncpa [#allocation4], 1 }

</bundles_post_ra>
